<compile_context>
chip_gen: v7x
topology: tpu7x:2x2x1
jax: 0.10.0
libtpu: 0.0.40
codegen_flags: <defaults>
</compile_context>

<pallas_src>
import numpy as np
import jax
import jax.numpy as jnp
from jax.experimental import pallas as pl
from jax.experimental.pallas import tpu as pltpu


def _round_up(x, m):
    return ((x + m - 1) // m) * m


def _packed_time_encode_kernel(ts_ref, e_ref, freq_ref, phase_ref, out_ref):
    """One row-tile, packed layout.

    ts_ref:    (TM, KP)  P packed timestamps per row (KP = P rounded up to 8)
    e_ref:     (KP, W)   constant 0/1 expansion matrix
    freq_ref:  (1, W)    basis_freq tiled P times (lane-dense)
    phase_ref: (1, W)    phase tiled P times
    out_ref:   (TM, W)
    """
    # Lane expansion on the MXU.  E is 0/1, so at HIGHEST precision the result
    # is exactly the packed timestamps broadcast over their D-lane groups.
    ts_exp = jnp.dot(
        ts_ref[...], e_ref[...],
        preferred_element_type=jnp.float32,
        precision=jax.lax.Precision.HIGHEST,
    )
    out_ref[...] = jnp.cos(ts_exp * freq_ref[...] + phase_ref[...]).astype(out_ref.dtype)


def _broadcast_time_encode_kernel(ts_ref, freq_ref, phase_ref, out_ref):
    """Fallback (one timestamp per row): (TM, 1) broadcasts across all W lanes."""
    out_ref[...] = jnp.cos(ts_ref[...] * freq_ref[...] + phase_ref[...]).astype(out_ref.dtype)


def time_encode(ts, basis_freq, phase, *, block_rows=8192, out_dtype=jnp.float32):
    """ts: [B, L] float; basis_freq, phase: [D] float -> [B, L, D] out_dtype."""
    B, L = ts.shape
    D = int(basis_freq.shape[0])
    N = B * L

    packed = (D < 128) and (128 % D == 0)
    if packed:
        P = 128 // D                 # timestamps packed per output row
        W = 128                      # lane-dense output width
        KP = _round_up(P, 8)         # matmul K (sublane-friendly)
    else:
        # One timestamp per row; pad lanes to a multiple of 128 with dummy
        # freq/phase lanes so stores stay dense unmasked vst.
        P = 1
        W = _round_up(D, 128)
        KP = 1

    rows = pl.cdiv(N, P)

    # --- Row-tile size from an explicit VMEM budget --------------------------
    # Per row, double buffered: output block (W lanes, f32) + ts block, which is
    # lane-padded to 128 lanes regardless of KP.
    bytes_per_row = 2 * W * 4 + 2 * 128 * 4
    vmem_budget = 24 * 1024 * 1024           # headroom under the 32 MiB limit below
    rows_cap = max(8, (vmem_budget // bytes_per_row) // 8 * 8)
    tm = max(8, min(block_rows, rows_cap, _round_up(rows, 8)))
    # Keep >= ~4 grid steps on large problems so both v7x TensorCores get work,
    # without shrinking tiles below ~2048 rows.
    if rows >= 4 * 2048:
        tm = min(tm, max(2048, _round_up(pl.cdiv(rows, 4), 8)))

    rows_padded = _round_up(rows, tm)
    num_tiles = rows_padded // tm

    # --- Host-side packing ----------------------------------------------------
    ts_flat = ts.reshape(-1).astype(jnp.float32)
    if rows_padded * P != N:
        ts_flat = jnp.pad(ts_flat, (0, rows_padded * P - N))
    ts_packed = ts_flat.reshape(rows_padded, P)
    if KP != P:
        ts_packed = jnp.pad(ts_packed, ((0, 0), (0, KP - P)))

    freq = basis_freq.astype(jnp.float32)
    phs = phase.astype(jnp.float32)
    if packed:
        freq_w = jnp.tile(freq, P).reshape(1, W)
        phase_w = jnp.tile(phs, P).reshape(1, W)
        e_np = np.zeros((KP, W), np.float32)
        for q in range(P):
            e_np[q, q * D:(q + 1) * D] = 1.0     # 0/1 expansion matrix
        e_mat = jnp.asarray(e_np)
    else:
        freq_w = jnp.pad(freq, (0, W - D)).reshape(1, W)
        phase_w = jnp.pad(phs, (0, W - D)).reshape(1, W)

    cost = pl.CostEstimate(
        flops=2 * rows_padded * KP * W + 2 * rows_padded * W,
        transcendentals=rows_padded * W,
        bytes_accessed=4 * rows_padded * (KP + W),
    )
    cparams = pltpu.CompilerParams(
        dimension_semantics=("parallel",),        # shard row tiles across TCs (v7x)
        vmem_limit_bytes=32 * 1024 * 1024,        # safe on v5e/v6e/v7x physical VMEM
    )

    if packed:
        out_packed = pl.pallas_call(
            _packed_time_encode_kernel,
            out_shape=jax.ShapeDtypeStruct((rows_padded, W), out_dtype),
            grid_spec=pltpu.PrefetchScalarGridSpec(
                num_scalar_prefetch=0,
                grid=(num_tiles,),
                in_specs=[
                    pl.BlockSpec((tm, KP), lambda r: (r, 0)),
                    pl.BlockSpec((KP, W), lambda r: (0, 0)),   # constant block index
                    pl.BlockSpec((1, W), lambda r: (0, 0)),    # -> no re-DMA per step
                    pl.BlockSpec((1, W), lambda r: (0, 0)),
                ],
                out_specs=pl.BlockSpec((tm, W), lambda r: (r, 0)),
            ),
            compiler_params=cparams,
            cost_estimate=cost,
        )(ts_packed, e_mat, freq_w, phase_w)
        # Row-major identity: packed (r, q*D + d) == flat ((r*P + q)*D + d) == out[n, d].
        return out_packed.reshape(-1)[: N * D].reshape(B, L, D)

    out_padded = pl.pallas_call(
        _broadcast_time_encode_kernel,
        out_shape=jax.ShapeDtypeStruct((rows_padded, W), out_dtype),
        grid_spec=pltpu.PrefetchScalarGridSpec(
            num_scalar_prefetch=0,
            grid=(num_tiles,),
            in_specs=[
                pl.BlockSpec((tm, 1), lambda r: (r, 0)),
                pl.BlockSpec((1, W), lambda r: (0, 0)),
                pl.BlockSpec((1, W), lambda r: (0, 0)),
            ],
            out_specs=pl.BlockSpec((tm, W), lambda r: (r, 0)),
        ),
        compiler_params=cparams,
        cost_estimate=cost,
    )(ts_packed, freq_w, phase_w)
    return out_padded[:N, :D].reshape(B, L, D)


if __name__ == "__main__":
    # Small shapes: batch=2, seq_len=8, expand_dim (time_dim)=32
    B, L, D = 2, 8, 32

    # Deterministic parameter init mirroring TimeEncode.__init__
    basis_freq = jnp.asarray(1.0 / 10 ** np.linspace(0, 9, D), dtype=jnp.float32)
    phase = jnp.zeros((D,), dtype=jnp.float32)

    # Deterministic example timestamps
    key = jax.random.PRNGKey(0)
    ts = jax.random.uniform(key, (B, L), dtype=jnp.float32) * 100.0

    out = time_encode(ts, basis_freq, phase)
    out = jax.block_until_ready(out)

    # Reference check in plain JAX (same math as the PyTorch module)
    ref = jnp.cos(ts[:, :, None] * basis_freq[None, None, :] + phase[None, None, :])
    np.testing.assert_allclose(np.asarray(out), np.asarray(ref), rtol=1e-5, atol=1e-5)

    print("KERNEL_OK")
</pallas_src>

<mosaic_0001>
module attributes {stable_mosaic.version = 11 : i64} {
  func.func @_packed_time_encode_kernel(%arg0: i32, %arg1: memref<8x8xf32, #tpu.memory_space<vmem>>, %arg2: memref<8x128xf32, #tpu.memory_space<vmem>>, %arg3: memref<1x128xf32, #tpu.memory_space<vmem>>, %arg4: memref<1x128xf32, #tpu.memory_space<vmem>>, %arg5: memref<8x128xf32, #tpu.memory_space<vmem>>) attributes {dimension_semantics = [#tpu.dimension_semantics<parallel>], iteration_bounds = array<i64: 1>, scalar_prefetch = 0 : i64, scratch_operands = 0 : i64, tpu.core_type = #tpu.core_type<tc>, window_params = [{transform_indices = @transform_0, window_bounds = array<i64: 8, 8>}, {pipeline_mode = #tpu.pipeline_mode<synchronous>, transform_indices = @transform_1, window_bounds = array<i64: 8, 128>}, {pipeline_mode = #tpu.pipeline_mode<synchronous>, transform_indices = @transform_2, window_bounds = array<i64: 1, 128>}, {pipeline_mode = #tpu.pipeline_mode<synchronous>, transform_indices = @transform_3, window_bounds = array<i64: 1, 128>}, {transform_indices = @transform_4, window_bounds = array<i64: 8, 128>}]} {
    %c0 = arith.constant 0 : index
    %c0_0 = arith.constant 0 : index
    %0 = vector.load %arg1[%c0, %c0_0] : memref<8x8xf32, #tpu.memory_space<vmem>>, vector<8x8xf32>
    %c0_1 = arith.constant 0 : index
    %c0_2 = arith.constant 0 : index
    %1 = vector.load %arg2[%c0_1, %c0_2] : memref<8x128xf32, #tpu.memory_space<vmem>>, vector<8x128xf32>
    %cst = arith.constant dense<0.000000e+00> : vector<8x128xf32>
    %2 = tpu.matmul %0, %1, %cst {dimension_numbers = #tpu.dot_dimension_numbers<[1], [0], [0], [1], [0, 0, 1, 1], [], []>, precision = #tpu.contract_precision<fp32>} : vector<8x8xf32>, vector<8x128xf32>, vector<8x128xf32> -> vector<8x128xf32>
    %c0_3 = arith.constant 0 : index
    %c0_4 = arith.constant 0 : index
    %3 = vector.load %arg3[%c0_3, %c0_4] : memref<1x128xf32, #tpu.memory_space<vmem>>, vector<1x128xf32>
    %4 = vector.broadcast %3 : vector<1x128xf32> to vector<8x128xf32>
    %5 = arith.mulf %2, %4 : vector<8x128xf32>
    %c0_5 = arith.constant 0 : index
    %c0_6 = arith.constant 0 : index
    %6 = vector.load %arg4[%c0_5, %c0_6] : memref<1x128xf32, #tpu.memory_space<vmem>>, vector<1x128xf32>
    %7 = vector.broadcast %6 : vector<1x128xf32> to vector<8x128xf32>
    %8 = arith.addf %5, %7 : vector<8x128xf32>
    %9 = math.cos %8 : vector<8x128xf32>
    %c0_7 = arith.constant 0 : index
    %c0_8 = arith.constant 0 : index
    %10 = vector.load %arg5[%c0_7, %c0_8] : memref<8x128xf32, #tpu.memory_space<vmem>>, vector<8x128xf32>
    tpu.vector_store %arg5[%c0_7, %c0_8], %9 {strides = array<i32>} : memref<8x128xf32, #tpu.memory_space<vmem>>, vector<8x128xf32>,
    return
  }
  func.func @transform_0(%arg0: i32) -> (i32, i32) {
    %c0_i32 = arith.constant 0 : i32
    %c0_i32_0 = arith.constant 0 : i32
    return %arg0, %c0_i32 : i32, i32
  }
  func.func @transform_1(%arg0: i32) -> (i32, i32) {
    %c0_i32 = arith.constant 0 : i32
    %c0_i32_0 = arith.constant 0 : i32
    %c0_i32_1 = arith.constant 0 : i32
    return %c0_i32, %c0_i32_0 : i32, i32
  }
  func.func @transform_2(%arg0: i32) -> (i32, i32) {
    %c0_i32 = arith.constant 0 : i32
    %c0_i32_0 = arith.constant 0 : i32
    %c0_i32_1 = arith.constant 0 : i32
    return %c0_i32, %c0_i32_0 : i32, i32
  }
  func.func @transform_3(%arg0: i32) -> (i32, i32) {
    %c0_i32 = arith.constant 0 : i32
    %c0_i32_0 = arith.constant 0 : i32
    %c0_i32_1 = arith.constant 0 : i32
    return %c0_i32, %c0_i32_0 : i32, i32
  }
  func.func @transform_4(%arg0: i32) -> (i32, i32) {
    %c0_i32 = arith.constant 0 : i32
    %c0_i32_0 = arith.constant 0 : i32
    return %arg0, %c0_i32 : i32, i32
  }
}

</mosaic_0001>

<bundles_post_ra>
// kernel: tpu_custom_call.1
= control target key start
LH: loop header
LB: loop body
LE: loop exit
PB: predicated region body
PF: predicated region fallthrough
CT: control target
= control target key end

     0   :  { %9 = vsyncpa [#allocation3], 0  ;;  %s883_s0 = inlined_call_operand.hbm [shape: f32[8,8], index: 0, kind: input, shape index: {}]   ;;  %s884_s1 = inlined_call_operand.hbm [shape: f32[8,128], index: 1, kind: input, shape index: {}]   ;;  %s885_s2 = inlined_call_operand.vmem [shape: f32[1,128], index: 2, kind: input, shape index: {}]   ;;  %s886_s3 = inlined_call_operand.vmem [shape: f32[1,128], index: 3, kind: input, shape index: {}]   ;;  %s887_s4 = inlined_call_operand.hbm [shape: f32[8,128], index: 4, kind: output, shape index: {}]  }
   0x1   :  { %10 = vsyncpa [#allocation6], 0 }
   0x2   :  { %11 = vsyncpa [#allocation4], 0  ;;  %s778_s15 = smov [#allocation2]   ;;  %s779_s17 = smov [#allocation5]  }
   0x3   :  { %s18_s16 = sshll.u32 %s778_s15, 4  ;;  %s28_s18 = sshll.u32 %s779_s17, 4  ;;  %s19_s16 = int_to_ptr.vmem [resolvable:$true] %s18_s16  ;;  %s29_s18 = int_to_ptr.vmem [resolvable:$true] %s28_s18 }
   0x4   :  { %s706_s21 = scalar_lea.hbm %s883_s0, 128 }
   0x5   :  { %p707_p0 = scmp.ne.s32.totalorder %s883_s0, %s706_s21  ;;  %p710_p1 = scmp.lt.u32.totalorder %s706_s21, %s883_s0 }
   0x7   :  { %p712_p2 = pnand %p710_p1, %p707_p0 }
   0x9   :  { %715 = shalt.err (!%p712_p2)
}
   0xa   :  { %s716_s26 = scalar_lea.vmem %s19_s16, 128  ;;  %p721_p4 = scmp.lt.s32.totalorder %s19_s16, %s19_s16 }
   0xb   :  { %p717_p3 = scmp.ne.s32.totalorder %s19_s16, %s716_s26  ;;  %p722_p5 = scmp.lt.s32.totalorder %s716_s26, %s716_s26 }
   0xd   :  { %p723_p6 = por %p722_p5, %p721_p4 }
   0xf   :  { %p724_p7 = pnand %p723_p6, %p717_p3 }
  0x11   :  { %727 = shalt.err (!%p724_p7)
}
  0x12   :  { %21 = dma.hbm_to_vmem [thread:$0]  %s883_s0, 128, %s19_s16, [#allocation3]  }
  0x13   :  { %s728_s5 = scalar_lea.hbm %s884_s1, 128 }
  0x14   :  { %p729_p8 = scmp.ne.s32.totalorder %s884_s1, %s728_s5  ;;  %p732_p9 = scmp.lt.u32.totalorder %s728_s5, %s884_s1 }
  0x16   :  { %p734_p10 = pnand %p732_p9, %p729_p8 }
  0x18   :  { %737 = shalt.err (!%p734_p10)
}
  0x19   :  { %s738_s10 = scalar_lea.vmem %s29_s18, 128  ;;  %p743_p12 = scmp.lt.s32.totalorder %s29_s18, %s29_s18 }
  0x1a   :  { %p739_p11 = scmp.ne.s32.totalorder %s29_s18, %s738_s10  ;;  %p744_p13 = scmp.lt.s32.totalorder %s738_s10, %s738_s10 }
  0x1c   :  { %p745_p0 = por %p744_p13, %p743_p12 }
  0x1e   :  { %p746_p1 = pnand %p745_p0, %p739_p11 }
  0x20   :  { %749 = shalt.err (!%p746_p1)
}
  0x21   :  { %31 = dma.hbm_to_vmem [thread:$0]  %s884_s1, 128, %s29_s18, [#allocation6]  }
  0x22   :  { %772 = dma.done.wait [#allocation3], 128  }
  0x23   :  { %773 = vsyncadd [#allocation3], 4294967168 }
  0x24   :  { %774 = dma.done.wait [#allocation6], 128  }
  0x25   :  { %775 = vsyncadd [#allocation6], 4294967168  ;;  %v780_v0 = vmov 0.0   ;;  %vm781_vm0 = vmmov 0   ;;  %vm44_vm1 = vcmask 64512   ;;  %v43_v1 = vld [vmem:[#allocation5] sm:$0xff] }
  0x26   :  { %663 = vmatprep.subr.mxu0 %v780_v0  ;;  %665 = vmatprep.mubr.msk.f32.mxu0 %vm781_vm0, %v780_v0  ;;  %v42_v2 = vld [vmem:[#allocation2] sm:$0xff]  ;;  %v49_v3 = vand.u32 4294901760, %v43_v1  ;;  %v782_v33 = vmov 683565275   ;;  %v783_v35 = vmov 2475754826  }
  0x27   :  { %648 = vmatprep.subr.mxu1 %v780_v0  ;;  %650 = vmatprep.mubr.msk.f32.mxu1 %vm781_vm0, %v780_v0  ;;  %v46_v4 = vsel %vm44_vm1, %v42_v2, 0  ;;  %v630_v17 = vld [vmem:[%s885_s2] ss:$0 sm:$0xff]  ;;  %v784_v38 = vmov 2131351028   ;;  %s788_s2 = smov [#allocation7]  }
  0x28   :  { %v114_v5 = vand.u32 4294901760, %v46_v4  ;;  %v126_v6 = vsub.f32 %v43_v1, %v49_v3  ;;  %664 = vmatpush3.msra.mxu0 %v49_v3  ;;  %649 = vmatpush3.msra.mxu1 %v49_v3  ;;  %v631_v20 = vld [vmem:[%s886_s3] ss:$0 sm:$0xff]  ;;  %v785_v41 = vmov 2102212464   ;;  %s620_s3 = sshll.u32 %s788_s2, 4  ;;  %s621_s3 = int_to_ptr.vmem [resolvable:$true] %s620_s3 }
  0x29   :  { %653 = vmatprep.subr.mxu1 %v780_v0  ;;  %668 = vmatprep.subr.mxu0 %v780_v0  ;;  %v786_v44 = vmov 920167782   ;;  %v787_v47 = vmov 1326507024   ;;  %s750_s15 = scalar_lea.vmem %s621_s3, 128  ;;  %p755_p3 = scmp.lt.s32.totalorder %s621_s3, %s621_s3 }
  0x2a   :  { %v115_v7 = vsub.f32 %v46_v4, %v114_v5  ;;  %v127_v8 = vand.u32 4294901760, %v126_v6  ;;  %p751_p2 = scmp.ne.s32.totalorder %s621_s3, %s750_s15  ;;  %p756_p4 = scmp.lt.s32.totalorder %s750_s15, %s750_s15 }
  0x2c   :  { %v116_v9 = vand.u32 4294901760, %v115_v7  ;;  %v128_v10 = vsub.f32 %v126_v6, %v127_v8  ;;  %p757_p5 = por %p756_p4, %p755_p3 }
  0x2e   :  { %666 = vmatmul.mubr.f32.vlgmr.msra.gmra.mrb[0].mxu0 %v116_v9  ;;  %v117_v11 = vsub.f32 %v115_v7, %v116_v9  ;;  %v129_v12 = vand.u32 4294901760, %v128_v10  ;;  %p758_p6 = pnand %p757_p5, %p751_p2 }
  0x2f   :  { %669 = vmatpush3.msra.mxu0 %v127_v8  ;;  %670 = vmatprep.mubr.msk.f32.mxu0 %vm781_vm0, %v780_v0 }
  0x30   :  { %v118_v13 = vand.u32 4294901760, %v117_v11  ;;  %673 = vmatprep.subr.mxu0 %v780_v0 }
  0x32   :  { %651 = vmatmul.mubr.f32.vlgmr.msra.gmra.mrb[0].mxu1 %v118_v13 }
  0x33   :  { %654 = vmatpush3.msra.mxu1 %v129_v12  ;;  %655 = vmatprep.mubr.msk.f32.mxu1 %vm781_vm0, %v780_v0 }
  0x34   :  { %658 = vmatprep.subr.mxu1 %v780_v0 }
  0x36   :  { %671 = vmatmul.mubr.f32.vlgmr.msra.gmra.mrb[0].mxu0 %v114_v5 }
  0x37   :  { %674 = vmatpush3.msra.mxu0 %v49_v3  ;;  %675 = vmatprep.mubr.msk.f32.mxu0 %vm781_vm0, %v780_v0 }
  0x3a   :  { %656 = vmatmul.mubr.f32.vlgmr.msra.gmra.mrb[0].mxu1 %v114_v5 }
  0x3b   :  { %659 = vmatpush3.msra.mxu1 %v126_v6  ;;  %660 = vmatprep.mubr.msk.f32.mxu1 %vm781_vm0, %v780_v0 }
  0x3e   :  { %676 = vmatmul.mubr.f32.vlgmr.msra.gmra.mrb[0].mxu0 %v114_v5 }
  0x42   :  { %661 = vmatmul.mubr.f32.vlgmr.msra.gmra.mrb[0].mxu1 %v115_v7 }
 0x111   :  { %v490_v14 = vpop.f32.mrb[0].mxu0 }
 0x112   :  { %v677_v15 = vpop.f32.mrb[1].mxu0 }
 0x115   :  { %v270_v16 = vpop.f32.mrb[0].mxu1 }
 0x116   :  { %v678_v18 = vadd.f32 %v490_v14, %v270_v16  ;;  %v662_v19 = vpop.f32.mrb[1].mxu1 }
 0x118   :  { %v501_v21 = vmul.f32 %v678_v18, %v630_v17 }
 0x11a   :  { %v850_v22 = vadd.f32 %v631_v20, %v501_v21 }
 0x11c   :  { %v513_v23 = vand.u32 2139095040, %v850_v22  ;;  %v510_v27 = vand.u32 2147483647, %v850_v22  ;;  %vm512_vm9 = vcmp.lt.s32.totalorder %v850_v22, 0  ;;  %vm602_vm14 = vweird.f32 %v850_v22 }
 0x11e   :  { %v514_v24 = vshrl.u32 %v513_v23, 23  ;;  %v517_v31 = vand.u32 8388607, %v510_v27  ;;  %vm511_vm10 = vcmp.le.f32.partialorder %v510_v27, 0.7853982 }
 0x120   :  { %v632_v25 = vadd.s32 4294967169, %v514_v24  ;;  %v518_v49 = vor.u32 8388608, %v517_v31 }
 0x122   :  { %v520_v26 = vadd.s32 1, %v632_v25  ;;  %v558_v63 = vshll.u32 %v518_v49, 8 }
 0x124   :  { %vm521_vm2 = vcmp.gt.s32.totalorder %v520_v26, 0 }
 0x125   :  { %v522_v28 = vsel %vm521_vm2, %v520_v26, 0 }
 0x126   :  { %v524_v29 = vand.u32 31, %v522_v28  ;;  %v523_v32 = vshrl.u32 %v522_v28, 5 }
 0x128   :  { %v525_v30 = vsub.s32 32, %v524_v29  ;;  %v527_v34 = vshll.u32 %v782_v33, %v524_v29  ;;  %v530_v36 = vshll.u32 %v783_v35, %v524_v29  ;;  %v533_v40 = vshll.u32 %v784_v38, %v524_v29 }
 0x129   :  { %v536_v43 = vshll.u32 %v785_v41, %v524_v29  ;;  %v539_v46 = vshll.u32 %v786_v44, %v524_v29  ;;  %vm542_vm3 = vcmp.lt.s32.totalorder %v523_v32, 1  ;;  %vm545_vm4 = vcmp.lt.s32.totalorder %v523_v32, 4 }
 0x12a   :  { %v528_v37 = vshrl.u32 %v783_v35, %v525_v30  ;;  %v531_v39 = vshrl.u32 %v784_v38, %v525_v30  ;;  %v534_v42 = vshrl.u32 %v785_v41, %v525_v30  ;;  %v537_v45 = vshrl.u32 %v786_v44, %v525_v30 }
 0x12b   :  { %v540_v48 = vshrl.u32 %v787_v47, %v525_v30  ;;  %v526_v58 = vshrl.u32 %v782_v33, %v525_v30  ;;  %vm544_vm5 = vcmp.lt.s32.totalorder %v523_v32, 3  ;;  %vm543_vm6 = vcmp.lt.s32.totalorder %v523_v32, 2 }
 0x12c   :  { %v529_v50 = vor.u32 %v528_v37, %v527_v34  ;;  %v532_v51 = vor.u32 %v531_v39, %v530_v36  ;;  %v535_v52 = vor.u32 %v534_v42, %v533_v40  ;;  %v538_v53 = vor.u32 %v537_v45, %v536_v43 }
 0x12d   :  { %v541_v54 = vor.u32 %v540_v48, %v539_v46 }
 0x12e   :  { %v547_v55 = vsel %vm545_vm4, %v535_v52, 2102212464  ;;  %v550_v56 = vsel %vm542_vm3, %v529_v50, %v532_v51  ;;  %v554_v57 = vsel %vm542_vm3, %v532_v51, %v535_v52  ;;  %v551_v59 = vsel %vm545_vm4, %v538_v53, 920167782 }
 0x12f   :  { %v555_v60 = vsel %vm545_vm4, %v541_v54, 1326507024  ;;  %v552_v61 = vsel %vm544_vm5, %v535_v52, %v551_v59  ;;  %v546_v0 = vsel %vm542_vm3, %v526_v58, %v529_v50  ;;  %v548_v1 = vsel %vm544_vm5, %v532_v51, %v547_v55 }
 0x130   :  { %v556_v62 = vsel %vm544_vm5, %v538_v53, %v555_v60  ;;  %v553_v2 = vsel %vm543_vm6, %v550_v56, %v552_v61  ;;  %v549_v8 = vsel %vm543_vm6, %v546_v0, %v548_v1 }
 0x131   :  { %v557_v3 = vsel %vm543_vm6, %v554_v57, %v556_v62  ;;  %v859_v6 = vmul.u32.u64.low %v558_v63, %v553_v2  ;;  %v860_v7 = vmul.u32.u64.high %v558_v63, %v553_v2, %v859_v6  ;;  %v565_v10 = vmul.u32 %v558_v63, %v549_v8 }
 0x132   :  { %v856_v4 = vmul.u32.u64.low %v558_v63, %v557_v3  ;;  %v857_v5 = vmul.u32.u64.high %v558_v63, %v557_v3, %v856_v4 }
 0x133   :  { %v568_v9 = vadd.s32 1, %v860_v7 }
 0x134   :  { %vm567_vm7 = vc.u32 %v857_v5, %v859_v6  ;;  %v566_v23 = vadd.s32 %v859_v6, %v857_v5 }
 0x135   :  { %v569_v11 = vsel %vm567_vm7, %v568_v9, %v860_v7 }
 0x136   :  { %v570_v12 = vadd.s32 %v569_v11, %v565_v10 }
 0x138   :  { %v571_v13 = vadd.s32 536870912, %v570_v12 }
 0x13a   :  { %v572_v14 = vshrl.u32 %v571_v13, 30 }
 0x13c   :  { %v573_v15 = vshll.u32 %v572_v14, 30  ;;  %v596_v38 = vsub.s32 4, %v572_v14 }
 0x13e   :  { %v574_v16 = vsub.s32 %v570_v12, %v573_v15  ;;  %v597_v40 = vsel %vm512_vm9, %v596_v38, %v572_v14 }
 0x13f   :  { %v599_v41 = vsel %vm511_vm10, 0, %v597_v40 }
 0x140   :  { %v576_v17 = vsub.s32 0, %v574_v16  ;;  %v603_v42 = vand.u32 3, %v599_v41 }
 0x142   :  { %v633_v18 = vmin.u32 %v576_v17, %v574_v16  ;;  %vm608_vm11 = vcmp.eq.s32.totalorder %v603_v42, 2  ;;  %vm605_vm12 = vcmp.eq.s32.totalorder %v603_v42, 0  ;;  %vm604_vm13 = vcmp.lt.s32.totalorder %v603_v42, 2 }
 0x144   :  { %v578_v19 = vclz %v633_v18 }
 0x146   :  { %v634_v20 = vadd.s32 4294967294, %v578_v19 }
 0x148   :  { %vm635_vm8 = vcmp.lt.s32.totalorder %v634_v20, 0 }
 0x149   :  { %v581_v21 = vsel %vm635_vm8, 0, %v634_v20 }
 0x14a   :  { %v582_v24 = vsub.s32 32, %v581_v21  ;;  %v586_v25 = vsub.s32 4294967266, %v581_v21  ;;  %v583_v26 = vshll.u32 %v574_v16, %v581_v21 }
 0x14c   :  { %v584_v28 = vshrl.u32 %v566_v23, %v582_v24  ;;  %v587_v29 = vadd.s32 127, %v586_v25 }
 0x14e   :  { %v585_v30 = vor.u32 %v584_v28, %v583_v26  ;;  %v588_v31 = vshll.u32 %v587_v29, 23 }
 0x150   :  { %v589_v32 = vor.u32 4788187, %v588_v31  ;;  %v592_v34 = vcvt.s32.f32 %v585_v30 }
 0x152   :  { %v590_v33 = vand.u32 2147483647, %v589_v32 }
 0x154   :  { %v593_v35 = vmul.f32 %v592_v34, %v590_v33 }
 0x156   :  { %v594_v36 = vxor.u32 2147483648, %v593_v35 }
 0x158   :  { %v595_v37 = vsel %vm512_vm9, %v594_v36, %v593_v35 }
 0x159   :  { %v598_v39 = vsel %vm511_vm10, %v850_v22, %v595_v37 }
 0x15a   :  { %702 = vcosq.f32 %v598_v39 }
 0x15b   :  { %704 = vsinq.f32 %v598_v39 }
 0x164   :  { %v703_v43 = vpop.eup %702 }
 0x165   :  { %v705_v44 = vpop.eup %704  ;;  %v609_v45 = vxor.u32 2147483648, %v703_v43 }
 0x166   :  { %v606_v46 = vxor.u32 2147483648, %v705_v44 }
 0x167   :  { %v610_v47 = vsel %vm608_vm11, %v609_v45, %v705_v44 }
 0x168   :  { %v607_v27 = vsel %vm605_vm12, %v703_v43, %v606_v46 }
 0x169   :  { %v611_v48 = vsel %vm604_vm13, %v607_v27, %v610_v47 }
 0x16a   :  { %v612_v49 = vsel %vm602_vm14, nan, %v611_v48 }
 0x16b   :  { %613 = vst [vmem:[#allocation7] sm:$0xff] %v612_v49 }
 0x16c   :  { %761 = shalt.err (!%p758_p6)
}
 0x16d   :  { %s762_s18 = scalar_lea.hbm %s887_s4, 128 }
 0x16e   :  { %p763_p7 = scmp.ne.s32.totalorder %s887_s4, %s762_s18  ;;  %p766_p8 = scmp.lt.u32.totalorder %s762_s18, %s887_s4 }
 0x170   :  { %p768_p9 = pnand %p766_p8, %p763_p7 }
 0x172   :  { %771 = shalt.err (!%p768_p9)
}
 0x173   :  { %623 = dma.vmem_to_hbm [thread:$0]  %s621_s3, 128, %s887_s4, [#allocation4]  }
 0x174   :  { %776 = dma.done.wait [#allocation4], 128  }
 0x175   :  { %777 = vsyncadd [#allocation4], 4294967168 }
 0x176   :  { %627 = vsyncpa [#allocation3], 1 }
 0x177   :  { %628 = vsyncpa [#allocation6], 1 }
 0x178   :  { %629 = vsyncpa [#allocation4], 1 }

</bundles_post_ra>
